<compile_context>
chip_gen: v7x
topology: tpu7x:2x2x1
jax: 0.10.0
libtpu: 0.0.40
codegen_flags: <defaults>
</compile_context>

<pallas_src>
import functools

import jax
import jax.numpy as jnp
from jax.experimental import pallas as pl
from jax.experimental.pallas import tpu as pltpu

LANE = 128
SUBLANE = 8
MAX_TILE_ROWS = 4096   # 4096 x 128 x 4 B = 2 MiB per f32 input block


def _num_tensorcores() -> int:
    """TensorCores per chip: 2 on v7x, 1 on v5e/v6e (default 1 = always safe)."""
    try:
        kind = jax.devices()[0].device_kind.lower()
    except Exception:
        return 1
    return 2 if "v7" in kind else 1


_NUM_TENSORCORES = _num_tensorcores()


def _bce_sum_kernel(o_ref, l_ref, out_ref, *, tile_r, hard_labels):
    """Accumulate per-element log-likelihood terms into a resident (8, 128)
    block (one block per TensorCore split)."""
    i = pl.program_id(1)   # reduction axis (tiles within this split)

    @pl.when(i == 0)
    def _():
        out_ref[...] = jnp.zeros_like(out_ref)

    o = o_ref[...].astype(jnp.float32)
    t = l_ref[...].astype(jnp.float32)

    if hard_labels:
        # Labels are exactly {0, 1}: a single EUP log per element (exact,
        # halves transcendental traffic; relevant on v5e's single EUP slot).
        p = jnp.where(t > 0.5, o, 1.0 - o)
        ll = jnp.maximum(jnp.log(p), -100.0)
    else:
        # Exact nn.BCELoss expression.  Clamp each log at -100 BEFORE any
        # multiply so 0 * (-inf) never occurs (this is also what makes the
        # o=1, t=1 padding contribute exactly zero).
        log_o = jnp.maximum(jnp.log(o), -100.0)
        log_1mo = jnp.maximum(jnp.log(1.0 - o), -100.0)
        ll = t * (log_o - log_1mo) + log_1mo   # == t*log_o + (1-t)*log_1mo

    # Fold the (tile_r, 128) tile into the resident (8, 128) accumulator with
    # plain VPU adds; the single tiny cross-lane reduce, the negation and the
    # 1/n scale happen once in the wrapper.
    out_ref[...] += ll.reshape(tile_r // SUBLANE, SUBLANE, LANE).sum(axis=0)


def bce_loss_mean(output, labels, *, hard_labels=False,
                  max_tile_rows=MAX_TILE_ROWS):
    """Mean-reduced binary cross entropy (nn.BCELoss(reduction='mean')).

    `output` holds probabilities in [0, 1]; `labels` holds targets (any float
    or integer dtype; values are upcast to f32 inside the kernel).  Set
    hard_labels=True only when labels are exactly {0, 1}.
    """
    assert output.shape == labels.shape
    n = output.size
    assert n > 0

    flat_o = output.reshape(-1)
    flat_l = labels.reshape(-1)

    rows_min = -(-n // LANE)                                     # ceil(n/128)
    tile_r = min(max_tile_rows, -(-rows_min // SUBLANE) * SUBLANE)
    tiles_total = -(-rows_min // tile_r)
    num_splits = max(1, min(_NUM_TENSORCORES, tiles_total))
    tiles_per_split = -(-tiles_total // num_splits)
    padded_rows = num_splits * tiles_per_split * tile_r

    # Pad up to full tile granularity with loss-neutral values (o=1, t=1 gives
    # exactly 0 loss), so there is no mask and no index_map clamp in the hot
    # loop and no tile is ever streamed twice; we still divide by the true n.
    pad = padded_rows * LANE - n
    if pad:
        flat_o = jnp.pad(flat_o, (0, pad), constant_values=1)
        flat_l = jnp.pad(flat_l, (0, pad), constant_values=1)

    o2 = flat_o.reshape(padded_rows, LANE)
    l2 = flat_l.reshape(padded_rows, LANE)

    def in_map(s, i):
        return (s * tiles_per_split + i, 0)

    if num_splits > 1:
        # Guarantee the leading axis actually shards across the 2 TCs (v7x).
        lead_sem = getattr(pltpu, "CORE_PARALLEL", pltpu.PARALLEL)
        dim_sem = (lead_sem, pltpu.ARBITRARY)
    else:
        dim_sem = (pltpu.ARBITRARY, pltpu.ARBITRARY)

    kernel = functools.partial(_bce_sum_kernel, tile_r=tile_r,
                               hard_labels=hard_labels)

    partials = pl.pallas_call(
        kernel,
        out_shape=jax.ShapeDtypeStruct((num_splits * SUBLANE, LANE),
                                       jnp.float32),
        grid=(num_splits, tiles_per_split),
        in_specs=[
            pl.BlockSpec((tile_r, LANE), in_map),
            pl.BlockSpec((tile_r, LANE), in_map),
        ],
        out_specs=pl.BlockSpec((SUBLANE, LANE), lambda s, i: (s, 0)),
        compiler_params=pltpu.CompilerParams(
            dimension_semantics=dim_sem,
            vmem_limit_bytes=32 * 1024 * 1024),
    )(o2, l2)

    # Tiny epilogue: cross-lane reduce of a (splits*8, 128) f32 slab, negate
    # (folded out of the kernel) and scale by 1/n.
    # TODO(synk): could be moved in-kernel via a (1,1) SMEM output block if the
    # extra few-us XLA reduce ever shows up in profiles.
    return -jnp.sum(partials) / jnp.float32(n)


def _reference_bce(output, labels):
    o = output.astype(jnp.float32)
    t = labels.astype(jnp.float32)
    log_o = jnp.maximum(jnp.log(o), -100.0)
    log_1mo = jnp.maximum(jnp.log(1.0 - o), -100.0)
    return -jnp.mean(t * log_o + (1.0 - t) * log_1mo)


if __name__ == "__main__":
    key = jax.random.PRNGKey(0)
    k = jax.random.split(key, 6)

    # Primary case: small NCHW probability tensor, consistent with BCELoss use.
    shape = (2, 4, 16, 16)
    output = jax.nn.sigmoid(jax.random.normal(k[0], shape, dtype=jnp.float32))
    labels = (jax.random.uniform(k[1], shape) > 0.5).astype(jnp.float32)
    loss = jax.block_until_ready(bce_loss_mean(output, labels))
    ref = _reference_bce(output, labels)
    assert jnp.allclose(loss, ref, rtol=2e-5, atol=1e-6), (loss, ref)

    # Padding path (numel not a multiple of 8*128) — loss-neutral padding.
    shape2 = (3, 5, 7, 11)
    out2 = jax.nn.sigmoid(jax.random.normal(k[2], shape2, dtype=jnp.float32))
    lab2 = (jax.random.uniform(k[3], shape2) > 0.5).astype(jnp.float32)
    loss2 = jax.block_until_ready(bce_loss_mean(out2, lab2))
    ref2 = _reference_bce(out2, lab2)
    assert jnp.allclose(loss2, ref2, rtol=2e-5, atol=1e-6), (loss2, ref2)

    # Multi-tile reduction path (forced small tile) + narrow label dtype:
    # bf16 {0,1} labels upcast losslessly in-kernel, halving label HBM traffic.
    shape3 = (2, 6, 128, 100)
    out3 = jax.nn.sigmoid(jax.random.normal(k[4], shape3, dtype=jnp.float32))
    lab3 = (jax.random.uniform(k[5], shape3) > 0.5).astype(jnp.float32)
    loss3 = jax.block_until_ready(
        bce_loss_mean(out3, lab3.astype(jnp.bfloat16), max_tile_rows=128))
    ref3 = _reference_bce(out3, lab3)
    assert jnp.allclose(loss3, ref3, rtol=2e-5, atol=1e-6), (loss3, ref3)

    # Hard-label fast path (single log/element): exact for {0,1} labels.
    loss4 = jax.block_until_ready(bce_loss_mean(output, labels,
                                                hard_labels=True))
    assert jnp.allclose(loss4, ref, rtol=2e-5, atol=1e-6), (loss4, ref)

    print("KERNEL_OK")
</pallas_src>

<mosaic_0001>
module attributes {stable_mosaic.version = 11 : i64} {
  func.func @_bce_sum_kernel(%arg0: i32, %arg1: i32, %arg2: memref<16x128xf32, #tpu.memory_space<vmem>>, %arg3: memref<16x128xf32, #tpu.memory_space<vmem>>, %arg4: memref<8x128xf32, #tpu.memory_space<vmem>>) attributes {dimension_semantics = [#tpu.dimension_semantics<arbitrary>, #tpu.dimension_semantics<arbitrary>], iteration_bounds = array<i64: 1, 1>, scalar_prefetch = 0 : i64, scratch_operands = 0 : i64, tpu.core_type = #tpu.core_type<tc>, window_params = [{transform_indices = @transform_0, window_bounds = array<i64: 16, 128>}, {transform_indices = @transform_1, window_bounds = array<i64: 16, 128>}, {transform_indices = @transform_2, window_bounds = array<i64: 8, 128>}]} {
    %c0_i32 = arith.constant 0 : i32
    %0 = arith.cmpi eq, %arg1, %c0_i32 : i32
    %1 = arith.extui %0 : i1 to i32
    %c0_i32_0 = arith.constant 0 : i32
    %2 = arith.cmpi ne, %1, %c0_i32_0 : i32
    scf.if %2 {
      %cst_11 = arith.constant 0.000000e+00 : f32
      %21 = vector.broadcast %cst_11 : f32 to vector<8x128xf32>
      %c0_12 = arith.constant 0 : index
      %c0_13 = arith.constant 0 : index
      %22 = vector.load %arg4[%c0_12, %c0_13] : memref<8x128xf32, #tpu.memory_space<vmem>>, vector<8x128xf32>
      tpu.vector_store %arg4[%c0_12, %c0_13], %21 {strides = array<i32>} : memref<8x128xf32, #tpu.memory_space<vmem>>, vector<8x128xf32>,
    } else {
    }
    %c0 = arith.constant 0 : index
    %c0_1 = arith.constant 0 : index
    %3 = vector.load %arg2[%c0, %c0_1] : memref<16x128xf32, #tpu.memory_space<vmem>>, vector<16x128xf32>
    %c0_2 = arith.constant 0 : index
    %c0_3 = arith.constant 0 : index
    %4 = vector.load %arg3[%c0_2, %c0_3] : memref<16x128xf32, #tpu.memory_space<vmem>>, vector<16x128xf32>
    %5 = math.log %3 : vector<16x128xf32>
    %cst = arith.constant -1.000000e+02 : f32
    %6 = vector.broadcast %cst : f32 to vector<16x128xf32>
    %7 = arith.maximumf %5, %6 : vector<16x128xf32>
    %cst_4 = arith.constant 1.000000e+00 : f32
    %8 = vector.broadcast %cst_4 : f32 to vector<16x128xf32>
    %9 = arith.subf %8, %3 : vector<16x128xf32>
    %10 = math.log %9 : vector<16x128xf32>
    %cst_5 = arith.constant -1.000000e+02 : f32
    %11 = vector.broadcast %cst_5 : f32 to vector<16x128xf32>
    %12 = arith.maximumf %10, %11 : vector<16x128xf32>
    %13 = arith.subf %7, %12 : vector<16x128xf32>
    %14 = arith.mulf %4, %13 : vector<16x128xf32>
    %15 = arith.addf %14, %12 : vector<16x128xf32>
    %c0_6 = arith.constant 0 : index
    %c0_7 = arith.constant 0 : index
    %16 = vector.load %arg4[%c0_6, %c0_7] : memref<8x128xf32, #tpu.memory_space<vmem>>, vector<8x128xf32>
    %17 = vector.shape_cast %15 : vector<16x128xf32> to vector<2x8x128xf32>
    %cst_8 = arith.constant dense<0.000000e+00> : vector<8x128xf32>
    %18 = vector.multi_reduction <add>, %17, %cst_8 [0] : vector<2x8x128xf32> to vector<8x128xf32>
    %19 = arith.addf %16, %18 : vector<8x128xf32>
    %c0_9 = arith.constant 0 : index
    %c0_10 = arith.constant 0 : index
    %20 = vector.load %arg4[%c0_9, %c0_10] : memref<8x128xf32, #tpu.memory_space<vmem>>, vector<8x128xf32>
    tpu.vector_store %arg4[%c0_9, %c0_10], %19 {strides = array<i32>} : memref<8x128xf32, #tpu.memory_space<vmem>>, vector<8x128xf32>,
    return
  }
  func.func @transform_0(%arg0: i32, %arg1: i32) -> (i32, i32) {
    %c1_i32 = arith.constant 1 : i32
    %0 = arith.muli %arg0, %c1_i32 : i32
    %1 = arith.addi %0, %arg1 : i32
    %c0_i32 = arith.constant 0 : i32
    %c0_i32_0 = arith.constant 0 : i32
    return %1, %c0_i32 : i32, i32
  }
  func.func @transform_1(%arg0: i32, %arg1: i32) -> (i32, i32) {
    %c1_i32 = arith.constant 1 : i32
    %0 = arith.muli %arg0, %c1_i32 : i32
    %1 = arith.addi %0, %arg1 : i32
    %c0_i32 = arith.constant 0 : i32
    %c0_i32_0 = arith.constant 0 : i32
    return %1, %c0_i32 : i32, i32
  }
  func.func @transform_2(%arg0: i32, %arg1: i32) -> (i32, i32) {
    %c0_i32 = arith.constant 0 : i32
    %c0_i32_0 = arith.constant 0 : i32
    return %arg0, %c0_i32 : i32, i32
  }
}

</mosaic_0001>

<bundles_post_ra>
// kernel: tpu_custom_call.1
= control target key start
LH: loop header
LB: loop body
LE: loop exit
PB: predicated region body
PF: predicated region fallthrough
CT: control target
= control target key end

     0   :  { %7 = vsyncpa [#allocation3], 0  ;;  %s243_s0 = inlined_call_operand.hbm [shape: f32[16,128], index: 0, kind: input, shape index: {}]   ;;  %s244_s1 = inlined_call_operand.hbm [shape: f32[16,128], index: 1, kind: input, shape index: {}]   ;;  %s245_s2 = inlined_call_operand.hbm [shape: f32[8,128], index: 2, kind: output, shape index: {}]  }
   0x1   :  { %8 = vsyncpa [#allocation6], 0 }
   0x2   :  { %9 = vsyncpa [#allocation4], 0  ;;  %s187_s9 = smov [#allocation2]   ;;  %s115_s13 = scalar_lea.hbm %s243_s0, 256 }
   0x3   :  { %s19_s10 = sshll.u32 %s187_s9, 4  ;;  %p116_p0 = scmp.ne.s32.totalorder %s243_s0, %s115_s13  ;;  %s20_s10 = int_to_ptr.vmem [resolvable:$true] %s19_s10 }
   0x4   :  { %p119_p1 = scmp.lt.u32.totalorder %s115_s13, %s243_s0 }
   0x6   :  { %p121_p2 = pnand %p119_p1, %p116_p0 }
   0x8   :  { %124 = shalt.err (!%p121_p2)
}
   0x9   :  { %s125_s18 = scalar_lea.vmem %s20_s10, 256  ;;  %p130_p4 = scmp.lt.s32.totalorder %s20_s10, %s20_s10 }
   0xa   :  { %p126_p3 = scmp.ne.s32.totalorder %s20_s10, %s125_s18  ;;  %p131_p5 = scmp.lt.s32.totalorder %s125_s18, %s125_s18 }
   0xc   :  { %p132_p6 = por %p131_p5, %p130_p4 }
   0xe   :  { %p133_p7 = pnand %p132_p6, %p126_p3 }
  0x10   :  { %136 = shalt.err (!%p133_p7)
}
  0x11   :  { %s188_s19 = smov 128   ;;  %s189_s20 = smov 8  }
  0x12   :  { %25 = dma.hbm_to_vmem [thread:$0]  %s243_s0, 256, %s20_s10, [#allocation3], %s188_s19, %s188_s19, %s189_s20  }
  0x13   :  { %s190_s23 = smov [#allocation5]   ;;  %s137_s27 = scalar_lea.hbm %s244_s1, 256 }
  0x14   :  { %s35_s24 = sshll.u32 %s190_s23, 4  ;;  %p138_p8 = scmp.ne.s32.totalorder %s244_s1, %s137_s27  ;;  %s36_s24 = int_to_ptr.vmem [resolvable:$true] %s35_s24 }
  0x15   :  { %p141_p9 = scmp.lt.u32.totalorder %s137_s27, %s244_s1 }
  0x17   :  { %p143_p10 = pnand %p141_p9, %p138_p8 }
  0x19   :  { %146 = shalt.err (!%p143_p10)
}
  0x1a   :  { %s147_s4 = scalar_lea.vmem %s36_s24, 256  ;;  %p152_p12 = scmp.lt.s32.totalorder %s36_s24, %s36_s24 }
  0x1b   :  { %p148_p11 = scmp.ne.s32.totalorder %s36_s24, %s147_s4  ;;  %p153_p13 = scmp.lt.s32.totalorder %s147_s4, %s147_s4 }
  0x1d   :  { %p154_p0 = por %p153_p13, %p152_p12 }
  0x1f   :  { %p155_p1 = pnand %p154_p0, %p148_p11 }
  0x21   :  { %158 = shalt.err (!%p155_p1)
}
  0x22   :  { %41 = dma.hbm_to_vmem [thread:$0]  %s244_s1, 256, %s36_s24, [#allocation6], %s188_s19, %s188_s19, %s189_s20  }
  0x23   :  { %181 = dma.done.wait [#allocation3], 256  }
  0x24   :  { %182 = vsyncadd [#allocation3], 4294967040 }
  0x25   :  { %183 = dma.done.wait [#allocation6], 256  }
  0x26   :  { %184 = vsyncadd [#allocation6], 4294967040  ;;  %v57_v0 = vld [vmem:[#allocation2] sm:$0xff]  ;;  %v58_v1 = vld [vmem:[#allocation2 + $0x8] sm:$0xff]  ;;  %s191_s1 = smov [#allocation7]  }
  0x27   :  { %107 = vlog2.f32 %v57_v0  ;;  %v67_v2 = vsub.f32 1.0, %v57_v0  ;;  %v68_v3 = vsub.f32 1.0, %v58_v1  ;;  %v59_v15 = vld [vmem:[#allocation5] sm:$0xff]  ;;  %v60_v17 = vld [vmem:[#allocation5 + $0x8] sm:$0xff]  ;;  %s91_s6 = sshll.u32 %s191_s1, 4  ;;  %s92_s6 = int_to_ptr.vmem [resolvable:$true] %s91_s6 }
  0x28   :  { %109 = vlog2.f32 %v58_v1  ;;  %s159_s7 = scalar_lea.vmem %s92_s6, 128  ;;  %p164_p3 = scmp.lt.s32.totalorder %s92_s6, %s92_s6 }
  0x29   :  { %111 = vlog2.f32 %v67_v2  ;;  %p160_p2 = scmp.ne.s32.totalorder %s92_s6, %s159_s7  ;;  %p165_p4 = scmp.lt.s32.totalorder %s159_s7, %s159_s7 }
  0x2a   :  { %113 = vlog2.f32 %v68_v3 }
  0x2b   :  { %p166_p5 = por %p165_p4, %p164_p3 }
  0x2d   :  { %p167_p6 = pnand %p166_p5, %p160_p2 }
  0x31   :  { %v108_v4 = vpop.eup %107 }
  0x32   :  { %v110_v5 = vpop.eup %109  ;;  %v62_v6 = vmul.f32 0.6931472, %v108_v4 }
  0x33   :  { %v112_v7 = vpop.eup %111  ;;  %v64_v8 = vmul.f32 0.6931472, %v110_v5 }
  0x34   :  { %v114_v9 = vpop.eup %113  ;;  %v65_v10 = vmax.f32 %v62_v6, -100.0  ;;  %v70_v11 = vmul.f32 0.6931472, %v112_v7 }
  0x35   :  { %v66_v12 = vmax.f32 %v64_v8, -100.0  ;;  %v72_v13 = vmul.f32 0.6931472, %v114_v9 }
  0x36   :  { %v73_v14 = vmax.f32 %v70_v11, -100.0 }
  0x37   :  { %v74_v16 = vmax.f32 %v72_v13, -100.0 }
  0x38   :  { %v75_v18 = vsub.f32 %v65_v10, %v73_v14 }
  0x39   :  { %v76_v19 = vsub.f32 %v66_v12, %v74_v16 }
  0x3a   :  { %v77_v20 = vmul.f32 %v75_v18, %v59_v15 }
  0x3b   :  { %v78_v21 = vmul.f32 %v76_v19, %v60_v17 }
  0x3c   :  { %v79_v22 = vadd.f32 %v77_v20, %v73_v14 }
  0x3d   :  { %v80_v23 = vadd.f32 %v78_v21, %v74_v16 }
  0x3f   :  { %v82_v24 = vadd.f32 %v80_v23, %v79_v22 }
  0x41   :  { %84 = vst [vmem:[#allocation7] sm:$0xff] %v82_v24 }
  0x42   :  { %170 = shalt.err (!%p167_p6)
}
  0x43   :  { %s171_s10 = scalar_lea.hbm %s245_s2, 128 }
  0x44   :  { %p172_p7 = scmp.ne.s32.totalorder %s245_s2, %s171_s10  ;;  %p175_p8 = scmp.lt.u32.totalorder %s171_s10, %s245_s2 }
  0x46   :  { %p177_p9 = pnand %p175_p8, %p172_p7 }
  0x48   :  { %180 = shalt.err (!%p177_p9)
}
  0x49   :  { %94 = dma.vmem_to_hbm [thread:$0]  %s92_s6, 128, %s245_s2, [#allocation4]  }
  0x4a   :  { %185 = dma.done.wait [#allocation4], 128  }
  0x4b   :  { %186 = vsyncadd [#allocation4], 4294967168 }
  0x4c   :  { %98 = vsyncpa [#allocation3], 1 }
  0x4d   :  { %99 = vsyncpa [#allocation6], 1 }
  0x4e   :  { %100 = vsyncpa [#allocation4], 1 }

</bundles_post_ra>
